<compile_context>
chip_gen: v5e
topology: v5e:2x2
jax: 0.10.0
libtpu: 0.0.40
codegen_flags: <defaults>
</compile_context>

<pallas_src>
import functools

import numpy as np
import jax
import jax.numpy as jnp
from jax.experimental import pallas as pl
from jax.experimental.pallas import tpu as pltpu


def _shift_lanes(v, m):
    """y[:, j] = v[:, j + m], zero-filled outside [0, L).  m is a static int."""
    if m == 0:
        return v
    c, length = v.shape
    pad = jnp.zeros((c, abs(m)), v.dtype)
    if m > 0:
        return jnp.concatenate([v[:, m:], pad], axis=1)
    return jnp.concatenate([pad, v[:, : length - (-m)]], axis=1)


def _nb1d_kernel(x_ref, w1_ref, w2_ref, w3_ref, w4_ref,
                 b1_ref, b2_ref, b3_ref, b4_ref, o_ref, *, img_w, dil):
    # x_ref/o_ref: (1, C, HW)  channel-major, HW on the lane axis (lane-dense)
    # w*_ref:      (3, C, C)   per-tap (C_out, C_in) matrices (BN scale folded)
    # b*_ref:      (C, 1)      per-channel additive term (bias / folded BN shift)
    x = x_ref[0]                                                   # (C, HW) f32
    hw = x.shape[1]

    # column index inside each image row, for the (1,3) boundary masks
    col = jax.lax.broadcasted_iota(jnp.int32, (1, hw), 1) % img_w

    def conv_h(v, w_ref, b_ref, s):
        # (3,1) conv along H: row shifts are multiples of img_w in the flat
        # layout, never cross a row boundary -> the zero fill IS the padding.
        acc = jnp.dot(w_ref[1], v, preferred_element_type=jnp.float32)
        acc += jnp.dot(w_ref[0], _shift_lanes(v, -s * img_w),
                       preferred_element_type=jnp.float32)
        acc += jnp.dot(w_ref[2], _shift_lanes(v, s * img_w),
                       preferred_element_type=jnp.float32)
        return acc + b_ref[...]

    def conv_w(v, w_ref, b_ref, s):
        # (1,3) conv along W: +-s lane shifts wrap across rows -> mask them.
        acc = jnp.dot(w_ref[1], v, preferred_element_type=jnp.float32)
        vm = jnp.where(col >= s, _shift_lanes(v, -s), 0.0)
        acc += jnp.dot(w_ref[0], vm, preferred_element_type=jnp.float32)
        vp = jnp.where(col < img_w - s, _shift_lanes(v, s), 0.0)
        acc += jnp.dot(w_ref[2], vp, preferred_element_type=jnp.float32)
        return acc + b_ref[...]

    y = jnp.maximum(conv_h(x, w1_ref, b1_ref, 1), 0.0)     # conv3x1_1 + ReLU
    y = jnp.maximum(conv_w(y, w2_ref, b2_ref, 1), 0.0)     # conv1x3_1 + BN1 + ReLU
    y = jnp.maximum(conv_h(y, w3_ref, b3_ref, dil), 0.0)   # conv3x1_2 + ReLU
    y = conv_w(y, w4_ref, b4_ref, dil)                     # conv1x3_2 + BN2
    # TODO(synk): training-mode Dropout2d not implemented (identity here).
    o_ref[0] = jnp.maximum(y + x, 0.0).astype(o_ref.dtype)  # residual + ReLU


def non_bottleneck_1d(x, w31_1, b31_1, w13_1, b13_1, g1, beta1, m1, v1,
                      w31_2, b31_2, w13_2, b13_2, g2, beta2, m2, v2,
                      dilated, eps=1e-3):
    N, C, H, W = x.shape
    HW = H * W
    f32 = jnp.float32

    # NCHW is already channel-major: flattening spatial to the lane axis is a
    # free reshape (no transpose), and the kernel output reshapes straight back.
    x_flat = x.reshape(N, C, HW).astype(f32)

    # per-tap (C_out, C_in) weight matrices; tap k corresponds to offset (k-1)*dil
    w1 = jnp.transpose(w31_1[:, :, :, 0], (2, 0, 1)).astype(f32)   # (3, C, C)
    w2 = jnp.transpose(w13_1[:, :, 0, :], (2, 0, 1)).astype(f32)
    w3 = jnp.transpose(w31_2[:, :, :, 0], (2, 0, 1)).astype(f32)
    w4 = jnp.transpose(w13_2[:, :, 0, :], (2, 0, 1)).astype(f32)

    # Fold the inference BatchNorms into the preceding conv (scale into the
    # output channel of the weights, mean/beta/bias into the additive term).
    s1 = (g1 / jnp.sqrt(v1 + eps)).astype(f32)
    s2 = (g2 / jnp.sqrt(v2 + eps)).astype(f32)
    w2 = w2 * s1[None, :, None]
    w4 = w4 * s2[None, :, None]
    b1 = b31_1.reshape(C, 1).astype(f32)
    b2 = (s1 * (b13_1 - m1) + beta1).reshape(C, 1).astype(f32)
    b3 = b31_2.reshape(C, 1).astype(f32)
    b4 = (s2 * (b13_2 - m2) + beta2).reshape(C, 1).astype(f32)

    kernel = functools.partial(_nb1d_kernel, img_w=W, dil=int(dilated))

    w_spec = pl.BlockSpec((3, C, C), lambda n: (0, 0, 0))   # grid-invariant
    b_spec = pl.BlockSpec((C, 1), lambda n: (0, 0))         # grid-invariant

    out_flat = pl.pallas_call(
        kernel,
        out_shape=jax.ShapeDtypeStruct((N, C, HW), f32),
        grid=(N,),
        in_specs=[
            pl.BlockSpec((1, C, HW), lambda n: (n, 0, 0)),
            w_spec, w_spec, w_spec, w_spec,
            b_spec, b_spec, b_spec, b_spec,
        ],
        out_specs=pl.BlockSpec((1, C, HW), lambda n: (n, 0, 0)),
        compiler_params=pltpu.CompilerParams(
            dimension_semantics=("parallel",)),
    )(x_flat, w1, w2, w3, w4, b1, b2, b3, b4)

    return out_flat.reshape(N, C, H, W)


def _reference(x, w31_1, b31_1, w13_1, b13_1, g1, beta1, m1, v1,
               w31_2, b31_2, w13_2, b13_2, g2, beta2, m2, v2, dilated, eps=1e-3):
    def conv(v, w, b, pad, dil):
        y = jax.lax.conv_general_dilated(
            v, w, window_strides=(1, 1), padding=pad, rhs_dilation=dil,
            dimension_numbers=("NCHW", "OIHW", "NCHW"))
        return y + b.reshape(1, -1, 1, 1)

    def bn(v, g, be, mu, var):
        s = g / jnp.sqrt(var + eps)
        return v * s.reshape(1, -1, 1, 1) + (be - mu * s).reshape(1, -1, 1, 1)

    d = int(dilated)
    y = jax.nn.relu(conv(x, w31_1, b31_1, ((1, 1), (0, 0)), (1, 1)))
    y = jax.nn.relu(bn(conv(y, w13_1, b13_1, ((0, 0), (1, 1)), (1, 1)),
                       g1, beta1, m1, v1))
    y = jax.nn.relu(conv(y, w31_2, b31_2, ((d, d), (0, 0)), (d, 1)))
    y = bn(conv(y, w13_2, b13_2, ((0, 0), (d, d)), (1, d)), g2, beta2, m2, v2)
    return jax.nn.relu(y + x)


if __name__ == "__main__":
    # Module config: chann=4, dropprob=0.0, dilated=2; small spatial 16x16.
    N, C, H, W = 2, 4, 16, 16
    dilated = 2

    key = jax.random.PRNGKey(0)
    ks = jax.random.split(key, 17)
    x = jax.random.normal(ks[0], (N, C, H, W), jnp.float32)
    w31_1 = jax.random.normal(ks[1], (C, C, 3, 1), jnp.float32) * 0.2
    b31_1 = jax.random.normal(ks[2], (C,), jnp.float32) * 0.1
    w13_1 = jax.random.normal(ks[3], (C, C, 1, 3), jnp.float32) * 0.2
    b13_1 = jax.random.normal(ks[4], (C,), jnp.float32) * 0.1
    g1 = 1.0 + 0.1 * jax.random.normal(ks[5], (C,), jnp.float32)
    beta1 = 0.1 * jax.random.normal(ks[6], (C,), jnp.float32)
    m1 = 0.1 * jax.random.normal(ks[7], (C,), jnp.float32)
    v1 = 0.5 + jax.random.uniform(ks[8], (C,), jnp.float32)
    w31_2 = jax.random.normal(ks[9], (C, C, 3, 1), jnp.float32) * 0.2
    b31_2 = jax.random.normal(ks[10], (C,), jnp.float32) * 0.1
    w13_2 = jax.random.normal(ks[11], (C, C, 1, 3), jnp.float32) * 0.2
    b13_2 = jax.random.normal(ks[12], (C,), jnp.float32) * 0.1
    g2 = 1.0 + 0.1 * jax.random.normal(ks[13], (C,), jnp.float32)
    beta2 = 0.1 * jax.random.normal(ks[14], (C,), jnp.float32)
    m2 = 0.1 * jax.random.normal(ks[15], (C,), jnp.float32)
    v2 = 0.5 + jax.random.uniform(ks[16], (C,), jnp.float32)

    out = non_bottleneck_1d(x, w31_1, b31_1, w13_1, b13_1, g1, beta1, m1, v1,
                            w31_2, b31_2, w13_2, b13_2, g2, beta2, m2, v2,
                            dilated)
    out = jax.block_until_ready(out)

    ref = _reference(x, w31_1, b31_1, w13_1, b13_1, g1, beta1, m1, v1,
                     w31_2, b31_2, w13_2, b13_2, g2, beta2, m2, v2, dilated)
    np.testing.assert_allclose(np.asarray(out), np.asarray(ref),
                               rtol=1e-3, atol=1e-3)
    assert out.shape == (N, C, H, W)

    print("KERNEL_OK")
</pallas_src>

<mosaic_0001>
module attributes {stable_mosaic.version = 11 : i64} {
  func.func @_nb1d_kernel(%arg0: i32, %arg1: memref<1x4x256xf32, #tpu.memory_space<vmem>>, %arg2: memref<3x4x4xf32, #tpu.memory_space<vmem>>, %arg3: memref<3x4x4xf32, #tpu.memory_space<vmem>>, %arg4: memref<3x4x4xf32, #tpu.memory_space<vmem>>, %arg5: memref<3x4x4xf32, #tpu.memory_space<vmem>>, %arg6: memref<4x1xf32, #tpu.memory_space<vmem>>, %arg7: memref<4x1xf32, #tpu.memory_space<vmem>>, %arg8: memref<4x1xf32, #tpu.memory_space<vmem>>, %arg9: memref<4x1xf32, #tpu.memory_space<vmem>>, %arg10: memref<1x4x256xf32, #tpu.memory_space<vmem>>) attributes {dimension_semantics = [#tpu.dimension_semantics<parallel>], iteration_bounds = array<i64: 2>, scalar_prefetch = 0 : i64, scratch_operands = 0 : i64, tpu.core_type = #tpu.core_type<tc>, window_params = [{transform_indices = @transform_0, window_bounds = array<i64: 1, 4, 256>}, {pipeline_mode = #tpu.pipeline_mode<synchronous>, transform_indices = @transform_1, window_bounds = array<i64: 3, 4, 4>}, {pipeline_mode = #tpu.pipeline_mode<synchronous>, transform_indices = @transform_2, window_bounds = array<i64: 3, 4, 4>}, {pipeline_mode = #tpu.pipeline_mode<synchronous>, transform_indices = @transform_3, window_bounds = array<i64: 3, 4, 4>}, {pipeline_mode = #tpu.pipeline_mode<synchronous>, transform_indices = @transform_4, window_bounds = array<i64: 3, 4, 4>}, {pipeline_mode = #tpu.pipeline_mode<synchronous>, transform_indices = @transform_5, window_bounds = array<i64: 4, 1>}, {pipeline_mode = #tpu.pipeline_mode<synchronous>, transform_indices = @transform_6, window_bounds = array<i64: 4, 1>}, {pipeline_mode = #tpu.pipeline_mode<synchronous>, transform_indices = @transform_7, window_bounds = array<i64: 4, 1>}, {pipeline_mode = #tpu.pipeline_mode<synchronous>, transform_indices = @transform_8, window_bounds = array<i64: 4, 1>}, {transform_indices = @transform_9, window_bounds = array<i64: 1, 4, 256>}]} {
    %c0 = arith.constant 0 : index
    %c0_0 = arith.constant 0 : index
    %c0_1 = arith.constant 0 : index
    %0 = vector.load %arg1[%c0, %c0_0, %c0_1] : memref<1x4x256xf32, #tpu.memory_space<vmem>>, vector<1x4x256xf32>
    %1 = vector.shape_cast %0 : vector<1x4x256xf32> to vector<4x256xf32>
    %2 = tpu.iota {dimensions = array<i32: 1>} : vector<1x256xi32>
    %c16_i32 = arith.constant 16 : i32
    %c0_i32 = arith.constant 0 : i32
    %3 = arith.cmpi eq, %c16_i32, %c0_i32 : i32
    %c1_i32 = arith.constant 1 : i32
    %4 = arith.select %3, %c1_i32, %c16_i32 : i32
    %5 = vector.broadcast %4 : i32 to vector<1x256xi32>
    %6 = arith.remsi %2, %5 : vector<1x256xi32>
    %c0_i32_2 = arith.constant 0 : i32
    %7 = vector.broadcast %c0_i32_2 : i32 to vector<1x256xi32>
    %8 = arith.cmpi ne, %6, %7 : vector<1x256xi32>
    %c0_i32_3 = arith.constant 0 : i32
    %9 = vector.broadcast %c0_i32_3 : i32 to vector<1x256xi32>
    %10 = arith.cmpi slt, %6, %9 : vector<1x256xi32>
    %c0_i32_4 = arith.constant 0 : i32
    %11 = arith.cmpi slt, %4, %c0_i32_4 : i32
    %12 = vector.broadcast %11 : i1 to vector<1x256xi1>
    %13 = vector.broadcast %12 : vector<1x256xi1> to vector<1x256xi1>
    %14 = arith.xori %10, %13 : vector<1x256xi1>
    %15 = arith.andi %14, %8 : vector<1x256xi1>
    %16 = vector.broadcast %4 : i32 to vector<1x256xi32>
    %17 = arith.addi %6, %16 : vector<1x256xi32>
    %18 = arith.select %15, %17, %6 : vector<1x256xi1>, vector<1x256xi32>
    %c1 = arith.constant 1 : index
    %c0_5 = arith.constant 0 : index
    %c0_6 = arith.constant 0 : index
    %19 = vector.load %arg2[%c1, %c0_5, %c0_6] : memref<3x4x4xf32, #tpu.memory_space<vmem>>, vector<1x4x4xf32>
    %20 = vector.shape_cast %19 : vector<1x4x4xf32> to vector<4x4xf32>
    %cst = arith.constant dense<0.000000e+00> : vector<4x256xf32>
    %21 = tpu.matmul %20, %1, %cst {dimension_numbers = #tpu.dot_dimension_numbers<[1], [0], [0], [1], [0, 0, 1, 1], [], []>} : vector<4x4xf32>, vector<4x256xf32>, vector<4x256xf32> -> vector<4x256xf32>
    %c0_7 = arith.constant 0 : index
    %c0_8 = arith.constant 0 : index
    %c0_9 = arith.constant 0 : index
    %22 = vector.load %arg2[%c0_7, %c0_8, %c0_9] : memref<3x4x4xf32, #tpu.memory_space<vmem>>, vector<1x4x4xf32>
    %23 = vector.shape_cast %22 : vector<1x4x4xf32> to vector<4x4xf32>
    %cst_10 = arith.constant 0.000000e+00 : f32
    %24 = vector.broadcast %cst_10 : f32 to vector<4x16xf32>
    %25 = vector.extract_strided_slice %1 {offsets = [0, 0], sizes = [4, 240], strides = [1, 1]} : vector<4x256xf32> to vector<4x240xf32>
    %26 = tpu.concatenate %24, %25 in 1 : vector<4x16xf32>, vector<4x240xf32> -> vector<4x256xf32>
    %cst_11 = arith.constant dense<0.000000e+00> : vector<4x256xf32>
    %27 = tpu.matmul %23, %26, %cst_11 {dimension_numbers = #tpu.dot_dimension_numbers<[1], [0], [0], [1], [0, 0, 1, 1], [], []>} : vector<4x4xf32>, vector<4x256xf32>, vector<4x256xf32> -> vector<4x256xf32>
    %28 = arith.addf %21, %27 : vector<4x256xf32>
    %c2 = arith.constant 2 : index
    %c0_12 = arith.constant 0 : index
    %c0_13 = arith.constant 0 : index
    %29 = vector.load %arg2[%c2, %c0_12, %c0_13] : memref<3x4x4xf32, #tpu.memory_space<vmem>>, vector<1x4x4xf32>
    %30 = vector.shape_cast %29 : vector<1x4x4xf32> to vector<4x4xf32>
    %cst_14 = arith.constant 0.000000e+00 : f32
    %31 = vector.broadcast %cst_14 : f32 to vector<4x16xf32>
    %32 = vector.extract_strided_slice %1 {offsets = [0, 16], sizes = [4, 240], strides = [1, 1]} : vector<4x256xf32> to vector<4x240xf32>
    %33 = tpu.concatenate %32, %31 in 1 : vector<4x240xf32>, vector<4x16xf32> -> vector<4x256xf32>
    %cst_15 = arith.constant dense<0.000000e+00> : vector<4x256xf32>
    %34 = tpu.matmul %30, %33, %cst_15 {dimension_numbers = #tpu.dot_dimension_numbers<[1], [0], [0], [1], [0, 0, 1, 1], [], []>} : vector<4x4xf32>, vector<4x256xf32>, vector<4x256xf32> -> vector<4x256xf32>
    %35 = arith.addf %28, %34 : vector<4x256xf32>
    %c0_16 = arith.constant 0 : index
    %c0_17 = arith.constant 0 : index
    %36 = vector.load %arg6[%c0_16, %c0_17] : memref<4x1xf32, #tpu.memory_space<vmem>>, vector<4x1xf32>
    %37 = vector.broadcast %36 : vector<4x1xf32> to vector<4x256xf32>
    %38 = arith.addf %35, %37 : vector<4x256xf32>
    %cst_18 = arith.constant 0.000000e+00 : f32
    %39 = vector.broadcast %cst_18 : f32 to vector<4x256xf32>
    %40 = arith.maximumf %38, %39 : vector<4x256xf32>
    %c1_19 = arith.constant 1 : index
    %c0_20 = arith.constant 0 : index
    %c0_21 = arith.constant 0 : index
    %41 = vector.load %arg3[%c1_19, %c0_20, %c0_21] : memref<3x4x4xf32, #tpu.memory_space<vmem>>, vector<1x4x4xf32>
    %42 = vector.shape_cast %41 : vector<1x4x4xf32> to vector<4x4xf32>
    %cst_22 = arith.constant dense<0.000000e+00> : vector<4x256xf32>
    %43 = tpu.matmul %42, %40, %cst_22 {dimension_numbers = #tpu.dot_dimension_numbers<[1], [0], [0], [1], [0, 0, 1, 1], [], []>} : vector<4x4xf32>, vector<4x256xf32>, vector<4x256xf32> -> vector<4x256xf32>
    %c1_i32_23 = arith.constant 1 : i32
    %44 = vector.broadcast %c1_i32_23 : i32 to vector<1x256xi32>
    %45 = arith.cmpi sge, %18, %44 : vector<1x256xi32>
    %cst_24 = arith.constant 0.000000e+00 : f32
    %46 = vector.broadcast %cst_24 : f32 to vector<4x1xf32>
    %47 = vector.extract_strided_slice %40 {offsets = [0, 0], sizes = [4, 255], strides = [1, 1]} : vector<4x256xf32> to vector<4x255xf32>
    %48 = tpu.concatenate %46, %47 in 1 : vector<4x1xf32>, vector<4x255xf32> -> vector<4x256xf32>
    %cst_25 = arith.constant 0.000000e+00 : f32
    %49 = vector.shape_cast %45 : vector<1x256xi1> to vector<1x256xi1>
    %50 = vector.broadcast %49 : vector<1x256xi1> to vector<4x256xi1>
    %51 = vector.broadcast %cst_25 : f32 to vector<4x256xf32>
    %52 = arith.select %50, %48, %51 : vector<4x256xi1>, vector<4x256xf32>
    %c0_26 = arith.constant 0 : index
    %c0_27 = arith.constant 0 : index
    %c0_28 = arith.constant 0 : index
    %53 = vector.load %arg3[%c0_26, %c0_27, %c0_28] : memref<3x4x4xf32, #tpu.memory_space<vmem>>, vector<1x4x4xf32>
    %54 = vector.shape_cast %53 : vector<1x4x4xf32> to vector<4x4xf32>
    %cst_29 = arith.constant dense<0.000000e+00> : vector<4x256xf32>
    %55 = tpu.matmul %54, %52, %cst_29 {dimension_numbers = #tpu.dot_dimension_numbers<[1], [0], [0], [1], [0, 0, 1, 1], [], []>} : vector<4x4xf32>, vector<4x256xf32>, vector<4x256xf32> -> vector<4x256xf32>
    %56 = arith.addf %43, %55 : vector<4x256xf32>
    %c15_i32 = arith.constant 15 : i32
    %57 = vector.broadcast %c15_i32 : i32 to vector<1x256xi32>
    %58 = arith.cmpi slt, %18, %57 : vector<1x256xi32>
    %cst_30 = arith.constant 0.000000e+00 : f32
    %59 = vector.broadcast %cst_30 : f32 to vector<4x1xf32>
    %60 = vector.extract_strided_slice %40 {offsets = [0, 1], sizes = [4, 255], strides = [1, 1]} : vector<4x256xf32> to vector<4x255xf32>
    %61 = tpu.concatenate %60, %59 in 1 : vector<4x255xf32>, vector<4x1xf32> -> vector<4x256xf32>
    %cst_31 = arith.constant 0.000000e+00 : f32
    %62 = vector.shape_cast %58 : vector<1x256xi1> to vector<1x256xi1>
    %63 = vector.broadcast %62 : vector<1x256xi1> to vector<4x256xi1>
    %64 = vector.broadcast %cst_31 : f32 to vector<4x256xf32>
    %65 = arith.select %63, %61, %64 : vector<4x256xi1>, vector<4x256xf32>
    %c2_32 = arith.constant 2 : index
    %c0_33 = arith.constant 0 : index
    %c0_34 = arith.constant 0 : index
    %66 = vector.load %arg3[%c2_32, %c0_33, %c0_34] : memref<3x4x4xf32, #tpu.memory_space<vmem>>, vector<1x4x4xf32>
    %67 = vector.shape_cast %66 : vector<1x4x4xf32> to vector<4x4xf32>
    %cst_35 = arith.constant dense<0.000000e+00> : vector<4x256xf32>
    %68 = tpu.matmul %67, %65, %cst_35 {dimension_numbers = #tpu.dot_dimension_numbers<[1], [0], [0], [1], [0, 0, 1, 1], [], []>} : vector<4x4xf32>, vector<4x256xf32>, vector<4x256xf32> -> vector<4x256xf32>
    %69 = arith.addf %56, %68 : vector<4x256xf32>
    %c0_36 = arith.constant 0 : index
    %c0_37 = arith.constant 0 : index
    %70 = vector.load %arg7[%c0_36, %c0_37] : memref<4x1xf32, #tpu.memory_space<vmem>>, vector<4x1xf32>
    %71 = vector.broadcast %70 : vector<4x1xf32> to vector<4x256xf32>
    %72 = arith.addf %69, %71 : vector<4x256xf32>
    %cst_38 = arith.constant 0.000000e+00 : f32
    %73 = vector.broadcast %cst_38 : f32 to vector<4x256xf32>
    %74 = arith.maximumf %72, %73 : vector<4x256xf32>
    %c1_39 = arith.constant 1 : index
    %c0_40 = arith.constant 0 : index
    %c0_41 = arith.constant 0 : index
    %75 = vector.load %arg4[%c1_39, %c0_40, %c0_41] : memref<3x4x4xf32, #tpu.memory_space<vmem>>, vector<1x4x4xf32>
    %76 = vector.shape_cast %75 : vector<1x4x4xf32> to vector<4x4xf32>
    %cst_42 = arith.constant dense<0.000000e+00> : vector<4x256xf32>
    %77 = tpu.matmul %76, %74, %cst_42 {dimension_numbers = #tpu.dot_dimension_numbers<[1], [0], [0], [1], [0, 0, 1, 1], [], []>} : vector<4x4xf32>, vector<4x256xf32>, vector<4x256xf32> -> vector<4x256xf32>
    %c0_43 = arith.constant 0 : index
    %c0_44 = arith.constant 0 : index
    %c0_45 = arith.constant 0 : index
    %78 = vector.load %arg4[%c0_43, %c0_44, %c0_45] : memref<3x4x4xf32, #tpu.memory_space<vmem>>, vector<1x4x4xf32>
    %79 = vector.shape_cast %78 : vector<1x4x4xf32> to vector<4x4xf32>
    %cst_46 = arith.constant 0.000000e+00 : f32
    %80 = vector.broadcast %cst_46 : f32 to vector<4x32xf32>
    %81 = vector.extract_strided_slice %74 {offsets = [0, 0], sizes = [4, 224], strides = [1, 1]} : vector<4x256xf32> to vector<4x224xf32>
    %82 = tpu.concatenate %80, %81 in 1 : vector<4x32xf32>, vector<4x224xf32> -> vector<4x256xf32>
    %cst_47 = arith.constant dense<0.000000e+00> : vector<4x256xf32>
    %83 = tpu.matmul %79, %82, %cst_47 {dimension_numbers = #tpu.dot_dimension_numbers<[1], [0], [0], [1], [0, 0, 1, 1], [], []>} : vector<4x4xf32>, vector<4x256xf32>, vector<4x256xf32> -> vector<4x256xf32>
    %84 = arith.addf %77, %83 : vector<4x256xf32>
    %c2_48 = arith.constant 2 : index
    %c0_49 = arith.constant 0 : index
    %c0_50 = arith.constant 0 : index
    %85 = vector.load %arg4[%c2_48, %c0_49, %c0_50] : memref<3x4x4xf32, #tpu.memory_space<vmem>>, vector<1x4x4xf32>
    %86 = vector.shape_cast %85 : vector<1x4x4xf32> to vector<4x4xf32>
    %cst_51 = arith.constant 0.000000e+00 : f32
    %87 = vector.broadcast %cst_51 : f32 to vector<4x32xf32>
    %88 = vector.extract_strided_slice %74 {offsets = [0, 32], sizes = [4, 224], strides = [1, 1]} : vector<4x256xf32> to vector<4x224xf32>
    %89 = tpu.concatenate %88, %87 in 1 : vector<4x224xf32>, vector<4x32xf32> -> vector<4x256xf32>
    %cst_52 = arith.constant dense<0.000000e+00> : vector<4x256xf32>
    %90 = tpu.matmul %86, %89, %cst_52 {dimension_numbers = #tpu.dot_dimension_numbers<[1], [0], [0], [1], [0, 0, 1, 1], [], []>} : vector<4x4xf32>, vector<4x256xf32>, vector<4x256xf32> -> vector<4x256xf32>
    %91 = arith.addf %84, %90 : vector<4x256xf32>
    %c0_53 = arith.constant 0 : index
    %c0_54 = arith.constant 0 : index
    %92 = vector.load %arg8[%c0_53, %c0_54] : memref<4x1xf32, #tpu.memory_space<vmem>>, vector<4x1xf32>
    %93 = vector.broadcast %92 : vector<4x1xf32> to vector<4x256xf32>
    %94 = arith.addf %91, %93 : vector<4x256xf32>
    %cst_55 = arith.constant 0.000000e+00 : f32
    %95 = vector.broadcast %cst_55 : f32 to vector<4x256xf32>
    %96 = arith.maximumf %94, %95 : vector<4x256xf32>
    %c1_56 = arith.constant 1 : index
    %c0_57 = arith.constant 0 : index
    %c0_58 = arith.constant 0 : index
    %97 = vector.load %arg5[%c1_56, %c0_57, %c0_58] : memref<3x4x4xf32, #tpu.memory_space<vmem>>, vector<1x4x4xf32>
    %98 = vector.shape_cast %97 : vector<1x4x4xf32> to vector<4x4xf32>
    %cst_59 = arith.constant dense<0.000000e+00> : vector<4x256xf32>
    %99 = tpu.matmul %98, %96, %cst_59 {dimension_numbers = #tpu.dot_dimension_numbers<[1], [0], [0], [1], [0, 0, 1, 1], [], []>} : vector<4x4xf32>, vector<4x256xf32>, vector<4x256xf32> -> vector<4x256xf32>
    %c2_i32 = arith.constant 2 : i32
    %100 = vector.broadcast %c2_i32 : i32 to vector<1x256xi32>
    %101 = arith.cmpi sge, %18, %100 : vector<1x256xi32>
    %cst_60 = arith.constant 0.000000e+00 : f32
    %102 = vector.broadcast %cst_60 : f32 to vector<4x2xf32>
    %103 = vector.extract_strided_slice %96 {offsets = [0, 0], sizes = [4, 254], strides = [1, 1]} : vector<4x256xf32> to vector<4x254xf32>
    %104 = tpu.concatenate %102, %103 in 1 : vector<4x2xf32>, vector<4x254xf32> -> vector<4x256xf32>
    %cst_61 = arith.constant 0.000000e+00 : f32
    %105 = vector.shape_cast %101 : vector<1x256xi1> to vector<1x256xi1>
    %106 = vector.broadcast %105 : vector<1x256xi1> to vector<4x256xi1>
    %107 = vector.broadcast %cst_61 : f32 to vector<4x256xf32>
    %108 = arith.select %106, %104, %107 : vector<4x256xi1>, vector<4x256xf32>
    %c0_62 = arith.constant 0 : index
    %c0_63 = arith.constant 0 : index
    %c0_64 = arith.constant 0 : index
    %109 = vector.load %arg5[%c0_62, %c0_63, %c0_64] : memref<3x4x4xf32, #tpu.memory_space<vmem>>, vector<1x4x4xf32>
    %110 = vector.shape_cast %109 : vector<1x4x4xf32> to vector<4x4xf32>
    %cst_65 = arith.constant dense<0.000000e+00> : vector<4x256xf32>
    %111 = tpu.matmul %110, %108, %cst_65 {dimension_numbers = #tpu.dot_dimension_numbers<[1], [0], [0], [1], [0, 0, 1, 1], [], []>} : vector<4x4xf32>, vector<4x256xf32>, vector<4x256xf32> -> vector<4x256xf32>
    %112 = arith.addf %99, %111 : vector<4x256xf32>
    %c14_i32 = arith.constant 14 : i32
    %113 = vector.broadcast %c14_i32 : i32 to vector<1x256xi32>
    %114 = arith.cmpi slt, %18, %113 : vector<1x256xi32>
    %cst_66 = arith.constant 0.000000e+00 : f32
    %115 = vector.broadcast %cst_66 : f32 to vector<4x2xf32>
    %116 = vector.extract_strided_slice %96 {offsets = [0, 2], sizes = [4, 254], strides = [1, 1]} : vector<4x256xf32> to vector<4x254xf32>
    %117 = tpu.concatenate %116, %115 in 1 : vector<4x254xf32>, vector<4x2xf32> -> vector<4x256xf32>
    %cst_67 = arith.constant 0.000000e+00 : f32
    %118 = vector.shape_cast %114 : vector<1x256xi1> to vector<1x256xi1>
    %119 = vector.broadcast %118 : vector<1x256xi1> to vector<4x256xi1>
    %120 = vector.broadcast %cst_67 : f32 to vector<4x256xf32>
    %121 = arith.select %119, %117, %120 : vector<4x256xi1>, vector<4x256xf32>
    %c2_68 = arith.constant 2 : index
    %c0_69 = arith.constant 0 : index
    %c0_70 = arith.constant 0 : index
    %122 = vector.load %arg5[%c2_68, %c0_69, %c0_70] : memref<3x4x4xf32, #tpu.memory_space<vmem>>, vector<1x4x4xf32>
    %123 = vector.shape_cast %122 : vector<1x4x4xf32> to vector<4x4xf32>
    %cst_71 = arith.constant dense<0.000000e+00> : vector<4x256xf32>
    %124 = tpu.matmul %123, %121, %cst_71 {dimension_numbers = #tpu.dot_dimension_numbers<[1], [0], [0], [1], [0, 0, 1, 1], [], []>} : vector<4x4xf32>, vector<4x256xf32>, vector<4x256xf32> -> vector<4x256xf32>
    %125 = arith.addf %112, %124 : vector<4x256xf32>
    %c0_72 = arith.constant 0 : index
    %c0_73 = arith.constant 0 : index
    %126 = vector.load %arg9[%c0_72, %c0_73] : memref<4x1xf32, #tpu.memory_space<vmem>>, vector<4x1xf32>
    %127 = vector.broadcast %126 : vector<4x1xf32> to vector<4x256xf32>
    %128 = arith.addf %125, %127 : vector<4x256xf32>
    %129 = arith.addf %128, %1 : vector<4x256xf32>
    %cst_74 = arith.constant 0.000000e+00 : f32
    %130 = vector.broadcast %cst_74 : f32 to vector<4x256xf32>
    %131 = arith.maximumf %129, %130 : vector<4x256xf32>
    %c0_75 = arith.constant 0 : index
    %c0_76 = arith.constant 0 : index
    %c0_77 = arith.constant 0 : index
    %132 = vector.load %arg10[%c0_75, %c0_76, %c0_77] : memref<1x4x256xf32, #tpu.memory_space<vmem>>, vector<1x4x256xf32>
    %133 = vector.shape_cast %132 : vector<1x4x256xf32> to vector<4x256xf32>
    %134 = vector.shape_cast %131 : vector<4x256xf32> to vector<1x4x256xf32>
    tpu.vector_store %arg10[%c0_75, %c0_76, %c0_77], %134 {strides = array<i32>} : memref<1x4x256xf32, #tpu.memory_space<vmem>>, vector<1x4x256xf32>,
    return
  }
  func.func @transform_0(%arg0: i32) -> (i32, i32, i32) {
    %c0_i32 = arith.constant 0 : i32
    %c0_i32_0 = arith.constant 0 : i32
    %c0_i32_1 = arith.constant 0 : i32
    return %arg0, %c0_i32, %c0_i32_0 : i32, i32, i32
  }
  func.func @transform_1(%arg0: i32) -> (i32, i32, i32) {
    %c0_i32 = arith.constant 0 : i32
    %c0_i32_0 = arith.constant 0 : i32
    %c0_i32_1 = arith.constant 0 : i32
    %c0_i32_2 = arith.constant 0 : i32
    return %c0_i32, %c0_i32_0, %c0_i32_1 : i32, i32, i32
  }
  func.func @transform_2(%arg0: i32) -> (i32, i32, i32) {
    %c0_i32 = arith.constant 0 : i32
    %c0_i32_0 = arith.constant 0 : i32
    %c0_i32_1 = arith.constant 0 : i32
    %c0_i32_2 = arith.constant 0 : i32
    return %c0_i32, %c0_i32_0, %c0_i32_1 : i32, i32, i32
  }
  func.func @transform_3(%arg0: i32) -> (i32, i32, i32) {
    %c0_i32 = arith.constant 0 : i32
    %c0_i32_0 = arith.constant 0 : i32
    %c0_i32_1 = arith.constant 0 : i32
    %c0_i32_2 = arith.constant 0 : i32
    return %c0_i32, %c0_i32_0, %c0_i32_1 : i32, i32, i32
  }
  func.func @transform_4(%arg0: i32) -> (i32, i32, i32) {
    %c0_i32 = arith.constant 0 : i32
    %c0_i32_0 = arith.constant 0 : i32
    %c0_i32_1 = arith.constant 0 : i32
    %c0_i32_2 = arith.constant 0 : i32
    return %c0_i32, %c0_i32_0, %c0_i32_1 : i32, i32, i32
  }
  func.func @transform_5(%arg0: i32) -> (i32, i32) {
    %c0_i32 = arith.constant 0 : i32
    %c0_i32_0 = arith.constant 0 : i32
    %c0_i32_1 = arith.constant 0 : i32
    return %c0_i32, %c0_i32_0 : i32, i32
  }
  func.func @transform_6(%arg0: i32) -> (i32, i32) {
    %c0_i32 = arith.constant 0 : i32
    %c0_i32_0 = arith.constant 0 : i32
    %c0_i32_1 = arith.constant 0 : i32
    return %c0_i32, %c0_i32_0 : i32, i32
  }
  func.func @transform_7(%arg0: i32) -> (i32, i32) {
    %c0_i32 = arith.constant 0 : i32
    %c0_i32_0 = arith.constant 0 : i32
    %c0_i32_1 = arith.constant 0 : i32
    return %c0_i32, %c0_i32_0 : i32, i32
  }
  func.func @transform_8(%arg0: i32) -> (i32, i32) {
    %c0_i32 = arith.constant 0 : i32
    %c0_i32_0 = arith.constant 0 : i32
    %c0_i32_1 = arith.constant 0 : i32
    return %c0_i32, %c0_i32_0 : i32, i32
  }
  func.func @transform_9(%arg0: i32) -> (i32, i32, i32) {
    %c0_i32 = arith.constant 0 : i32
    %c0_i32_0 = arith.constant 0 : i32
    %c0_i32_1 = arith.constant 0 : i32
    return %arg0, %c0_i32, %c0_i32_0 : i32, i32, i32
  }
}

</mosaic_0001>

<bundles_post_ra>
// kernel: tpu_custom_call.1
= control target key start
LH: loop header
LB: loop body
LE: loop exit
PB: predicated region body
PF: predicated region fallthrough
CT: control target
= control target key end

     0   :  { %s2056_s0 = inlined_call_operand.hbm [shape: f32[2,4,256], index: 0, kind: input, shape index: {}]   ;;  %s2057_s1 = inlined_call_operand.hbm [shape: f32[3,4,4], index: 1, kind: input, shape index: {}]   ;;  %s2058_s2 = inlined_call_operand.hbm [shape: f32[3,4,4], index: 2, kind: input, shape index: {}]   ;;  %s2059_s3 = inlined_call_operand.hbm [shape: f32[3,4,4], index: 3, kind: input, shape index: {}]   ;;  %s2060_s4 = inlined_call_operand.hbm [shape: f32[3,4,4], index: 4, kind: input, shape index: {}]   ;;  %s2061_s5 = inlined_call_operand.vmem [shape: f32[4,1], index: 5, kind: input, shape index: {}]   ;;  %s2062_s6 = inlined_call_operand.vmem [shape: f32[4,1], index: 6, kind: input, shape index: {}]   ;;  %s2063_s7 = inlined_call_operand.vmem [shape: f32[4,1], index: 7, kind: input, shape index: {}]   ;;  %s2064_s8 = inlined_call_operand.vmem [shape: f32[4,1], index: 8, kind: input, shape index: {}]   ;;  %s2065_s9 = inlined_call_operand.hbm [shape: f32[2,4,256], index: 9, kind: output, shape index: {}]  }
   0x1   :  { %2066 = sst [smem:[#allocation16_spill]] %s2057_s1 }
   0x2   :  { %2067 = sst [smem:[#allocation17_spill]] %s2058_s2 }
   0x3   :  { %2068 = sst [smem:[#allocation18_spill]] %s2059_s3 }
   0x4   :  { %2069 = sst [smem:[#allocation19_spill]] %s2060_s4 }
   0x5   :  { %14 = vsyncpa [#allocation3], 0 }
   0x6   :  { %16 = vsyncpa [#allocation3 + $0x1], 0 }
   0x7   :  { %17 = vsyncpa [#allocation6], 0 }
   0x8   :  { %18 = vsyncpa [#allocation9], 0 }
   0x9   :  { %19 = vsyncpa [#allocation4], 0 }
   0xa   :  { %21 = vsyncpa [#allocation4 + $0x1], 0  ;;  %s1808_s30 = smov 0   ;;  %s1810_s10 = smov 0  }
   0xb   :  { %s1812_s11 = smov 0   ;;  %s1814_s12 = smov 0  }
   0xc LB: > { %s2070_s1 = sld [smem:[#allocation16_spill]]  ;;  %s1832_s16 = sadd.s32 4294967295, %s1741_s12   ;;  %s1741_s12 = sphi %s1814_s12, %s2085_s12   ;;  %s1737_s11 = sphi %s1812_s11, %s2084_s11   ;;  %s1733_s10 = sphi %s1810_s10, %s2083_s10   ;;  %s1729_s30 = sphi %s1808_s30, %s2082_s30  }
   0xd   : > { %p1346_p0 = scmp.ge.s32.totalorder %s1741_s12, 1  ;;  %p48_p1 = scmp.eq.s32.totalorder %s1832_s16, 0 }
   0xe   : > { %p252_p2 = scmp.lt.s32.totalorder %s1741_s12, 3  ;;  %s1743_s18 = smov [#allocation5]  }
   0xf   : > { %s265_s19 = sshll.u32 %s1743_s18, 4  ;;  %s2072_s3 = sld [smem:[#allocation18_spill]]  ;;  %s266_s19 = int_to_ptr.vmem [resolvable:$true] %s265_s19 }
  0x10   : > { %p1837_p3 = pnand %p1346_p0, %p252_p2  ;;  %s2074_s2 = sld [smem:[#allocation17_spill]] }
  0x11   : > { %s1744_s27 = smov [#allocation8]   ;;  %s1745_s29 = smov 64  }
  0x12   : > { %s263_s15 = sshll.u32 %s2070_s1, 4  ;;  %p1437_p4 = pneg %p1837_p3  ;;  %s264_s15 = int_to_ptr.hbm [resolvable:$true] %s263_s15 }
  0x13   : > { %s293_s28 = sshll.u32 %s1744_s27, 4  ;;  %s1746_s13 = smov 4   ;;  %s294_s28 = int_to_ptr.vmem [resolvable:$true] %s293_s28 }
  0x14   : > { %p1849_p6 = pnand %p1437_p4, %p48_p1  ;;  %s2075_s4 = sld [smem:[#allocation19_spill]] }
  0x15   : > { %s291_s22 = sshll.u32 %s2072_s3, 4  ;;  %s1747_s21 = smov [#allocation7]   ;;  %s292_s22 = int_to_ptr.hbm [resolvable:$true] %s291_s22 }
  0x16   : > { %s277_s26 = sshll.u32 %s2074_s2, 4  ;;  %s279_s24 = sshll.u32 %s1747_s21, 4  ;;  %s278_s26 = int_to_ptr.hbm [resolvable:$true] %s277_s26  ;;  %s280_s24 = int_to_ptr.vmem [resolvable:$true] %s279_s24 }
  0x17   : > { %1440 = dma.hbm_to_vmem [thread:$0]  (!%p1849_p6), %s264_s15, 192, %s266_s19, [#allocation6], %s1745_s29, %s1745_s29, %s1746_s13  }
  0x18   : > { %1446 = dma.hbm_to_vmem [thread:$0]  (!%p1849_p6), %s292_s22, 192, %s294_s28, [#allocation9], %s1745_s29, %s1745_s29, %s1746_s13  }
  0x19   : > { %1443 = dma.hbm_to_vmem [thread:$0]  (!%p1849_p6), %s278_s26, 192, %s280_s24, [#allocation6], %s1745_s29, %s1745_s29, %s1746_s13  }
  0x1a   : > { %s305_s20 = sshll.u32 %s2075_s4, 4  ;;  %s1748_s15 = smov [#allocation10]   ;;  %s306_s20 = int_to_ptr.hbm [resolvable:$true] %s305_s20 }
  0x1b   : > { %s307_s19 = sshll.u32 %s1748_s15, 4  ;;  %s1345_s22 = sadd.s32 4294967294, %s1741_s12   ;;  %s308_s19 = int_to_ptr.vmem [resolvable:$true] %s307_s19 }
  0x1c   : > { %1449 = dma.hbm_to_vmem [thread:$0]  (!%p1849_p6), %s306_s20, 192, %s308_s19, [#allocation9], %s1745_s29, %s1745_s29, %s1746_s13  }
  0x1d   : > { %s1869_s25 = sadd.s32 1, %s1741_s12   ;;  %s34_s28 = sadd.s32 1, %s1737_s11 }
  0x1e   : > { %s31_s27 = ssub.s32 %s1741_s12, %s1869_s25  ;;  %p41_p8 = scmp.ne.s32.totalorder %s1737_s11, %s1733_s10 }
  0x1f   : > { %p32_p7 = scmp.eq.s32.totalorder %s31_s27, 0  ;;  %p42_p9 = scmp.eq.s32.totalorder %s1741_s12, 0 }
  0x20   : > { %p47_p10 = scmp.ne.s32.totalorder %s1733_s10, %s1729_s30  ;;  %p239_p13 = scmp.eq.s32.totalorder %s1832_s16, 1 }
  0x21   : > { %s1880_s26 = scalar_select %p32_p7, %s1737_s11, %s34_s28  }
  0x22   : > { %p1882_p11 = por %p42_p9, %p41_p8  ;;  %p1888_p12 = por %p48_p1, %p47_p10 }
  0x23   : > { %p245_p0 = scmp.eq.s32.totalorder %s1345_s22, 1  ;;  %p1462_p2 = scmp.lt.s32.totalorder %s1741_s12, 2 }
  0x24   : > { %s333_s29 = sand.u32 1, %s1737_s11   ;;  %p1895_p4 = por %p239_p13, %p41_p8 }
  0x25   : > { %p1899_p6 = por %p245_p0, %p47_p10  ;;  %s1352_s20 = sshll.u32 %s333_s29, 3 }
  0x26   : > { %s1415_s21 = sshll.u32 %s1741_s12, 3  ;;  %s337_s27 = scalar_lea.vmem [#allocation2], %s1352_s20 }
  0x27   : > { %s342_s19 = scalar_lea.hbm %s2056_s0, %s1415_s21  ;;  %s346_s28 = sshll.u32 %s337_s27, 4  ;;  %s347_s28 = int_to_ptr.vmem [resolvable:$true] %s346_s28 }
  0x28   : > { %s344_s1 = sshll.u32 %s342_s19, 4  ;;  %p1909_p7 = pnand %p1462_p2, %p1882_p11  ;;  %s345_s1 = int_to_ptr.hbm [resolvable:$true] %s344_s1 }
  0x29   : > { %s334_s2 = scalar_lea.sflag [#allocation3], %s333_s29  ;;  %s1637_s3 = sshra.s32 %s345_s1, 4  ;;  %s1638_s3 = int_to_ptr.hbm [resolvable:$true] %s1637_s3 }
  0x2a   : > { %s1639_s4 = scalar_lea.hbm %s1638_s3, 8  ;;  %p1641_p9 = pneg %p1909_p7 }
  0x2b   : > { %p1640_p8 = scmp.ne.s32.totalorder %s1638_s3, %s1639_s4  ;;  %s1644_s24 = scalar_lea.hbm %s2056_s0, 16 }
  0x2c   : > { %p1645_p11 = scmp.lt.s32.totalorder %s1638_s3, %s2056_s0  ;;  %p1646_p0 = scmp.lt.s32.totalorder %s1644_s24, %s1639_s4 }
  0x2d   : > { %p1642_p10 = pnand %p1641_p9, %p1640_p8 }
  0x2e   : > { %p1647_p2 = por %p1646_p0, %p1645_p11 }
  0x2f   : > { %p1643_p13 = pneg %p1642_p10 }
  0x31   : > { %p1648_p5 = pnand %p1647_p2, %p1643_p13 }
  0x33   : > { %1651 = shalt.err (!%p1648_p5)
}
  0x34   : > { %1453 = dma.hbm_to_vmem [thread:$0]  (!%p1909_p7), %s345_s1, 128, %s347_s28, %s334_s2  }
  0x35   : > { %355 = sbr.rel (%p1837_p3) target bundleno = 1132 (0x46c), region = 56  ;;  %s1926_s29 = sand.u32 (!%p1837_p3), 1, %s1733_s10  }
  0x36   : > { %s1356_s19 = sshll.u32 (!%p1837_p3), %s1926_s29, 3  ;;  %s358_s27 = scalar_lea.sflag (!%p1837_p3), [#allocation3], %s1926_s29 }
  0x37   : > { %s361_s3 = scalar_lea.vmem (!%p1837_p3), [#allocation2], %s1356_s19 }
  0x3a   : > { %1712 = dma.done.wait (%p1888_p12), %s358_s27, 128  }
  0x3b   : > { %1714 = vsyncadd (%p1888_p12), %s358_s27, 4294967168 }
  0x3c   : > { %1716 = dma.done.wait (%p48_p1), [#allocation6], 384  }
  0x3d   : > { %1718 = vsyncadd (%p48_p1), [#allocation6], 4294966912 }
  0x3e   : > { %1720 = dma.done.wait (%p48_p1), [#allocation9], 384  }
  0x3f   : > { %1722 = vsyncadd (%p48_p1), [#allocation9], 4294966912  ;;  %v417_v0 = vld [vmem:[%s361_s3] sm:$0xff]  ;;  %s1749_s1 = smov 16   ;;  %s1750_s2 = smov 112   ;;  %vm464_vm0 = vcmask 1043456   ;;  %v418_v35 = vlaneseq }
  0x40   : > { %449 = vst [vmem:[#allocation1] ss:$2 sm:$0xff] %v417_v0  ;;  %v446_v7 = vld [vmem:[#allocation5 + $0x4] sm:$0xf]  ;;  %vm460_vm1 = vcmask 31744   ;;  %v1751_v9 = vmov 0  }
  0x41   : > { %v623_v8 = vld [vmem:[%s2061_s5] sm:$0xf]  ;;  %1515 = vset.pattern.permute.xlu2 %v1751_v9  ;;  %1516 = vset.pattern.permute.xlu0 %v1751_v9  ;;  %vm456_vm2 = vcmask 130048   ;;  %v447_v11 = vld [vmem:[#allocation5] sm:$0xf]  ;;  %vm569_vm3 = vcmask 916480  }
  0x42   : > { %626 = vperm.xlu2 %1515, %v623_v8   ;;  %v561_v17 = vld [vmem:[#allocation5 + $0x8] sm:$0xf]  ;;  %s1752_s23 = smov 1   ;;  %s1753_s28 = smov 127   ;;  %v419_v36 = vand.u32 127, %v418_v35  ;;  %vm643_vm4 = vcmask 7168  }
  0x43   : > { %v634_v37 = vld [vmem:[#allocation7 + $0x4] sm:$0xf]  ;;  %v654_v41 = vld [vmem:[#allocation7] sm:$0xf]  ;;  %v821_v43 = vld [vmem:[%s2062_s6] sm:$0xf] }
  0x44   : > { %v1961_v38 = vand.u32 15, %v419_v36  ;;  %v999_v44 = vld [vmem:[%s2063_s7] sm:$0xf]  ;;  %v420_v45 = vadd.s32 128, %v419_v36  ;;  %vm757_vm6 = vcmask 1039360   ;;  %s1754_s15 = smov 32  }
  0x45   : > { %v769_v54 = vld [vmem:[#allocation7 + $0x8] sm:$0xf]  ;;  %s1755_s14 = smov 96   ;;  %v832_v8 = vld [vmem:[#allocation8 + $0x4] sm:$0xf]  ;;  %vm840_vm10 = vcmask 261120  }
  0x46   : > { %vm635_vm5 = vcmp.ge.s32.totalorder %v1961_v38, 1  ;;  %v1975_v46 = vand.u32 15, %v420_v45  ;;  %vm751_vm8 = vcmp.lt.s32.totalorder %v1961_v38, 15  ;;  %vm945_vm11 = vcmask 785408   ;;  %s1756_s27 = smov 126   ;;  %s1757_s3 = smov 2  }
  0x47   : > { %v450_v1 = vld.sshfl [vmem:[#allocation1] sm:$0xff pattern:$0x75316420]  ;;  %v451_v2 = vld.sshfl [vmem:[#allocation1 + $0x8] sm:$0xff pattern:$0x75316420] }
  0x48   : > { %452 = vrot.lane.b32.xlu0 %v450_v1, %s1749_s1  ;;  %510 = vst [vmem:[#allocation1] ss:$2 sm:$0xff] %v417_v0  ;;  %vm636_vm7 = vcmp.ge.s32.totalorder %v1975_v46, 1  ;;  %vm752_vm9 = vcmp.lt.s32.totalorder %v1975_v46, 15  ;;  %v1010_v35 = vld [vmem:[#allocation10 + $0x4] sm:$0xf] }
  0x49   : > { %vm1133_vm12 = vcmask 1031168   ;;  %vm1019_vm13 = vcmask 15360   ;;  %vm1128_vm14 = vcmp.lt.s32.totalorder %v1975_v46, 14  ;;  %vm1011_vm15 = vcmp.ge.s32.totalorder %v1961_v38, 2  ;;  %s1416_s4 = sshll.u32 %s1832_s16, 3  ;;  %s416_s22 = scalar_lea.vmem [#allocation11], %s1356_s19 }
  0x4a   : > { %s1234_s20 = sshll.u32 %s416_s22, 4  ;;  %s1221_s16 = scalar_lea.sflag [#allocation4], %s1926_s29  ;;  %s1235_s20 = int_to_ptr.vmem [resolvable:$true] %s1234_s20 }
  0x4b   : > { %s1687_s19 = scalar_lea.hbm %s2065_s9, 16 }
  0x4f   : > { %v511_v3 = vld.sshfl [vmem:[#allocation1] sm:$0xff pattern:$0x75316420]  ;;  %v512_v4 = vld.sshfl [vmem:[#allocation1 + $0x8] sm:$0xff pattern:$0x75316420] }
  0x50   : > { %454 = vrot.lane.b32.xlu0 %v451_v2, %s1749_s1  ;;  %562 = vst [vmem:[#allocation1] ss:$2 sm:$0xff] %v417_v0  ;;  %1366 = vmatpush.msk.msra.mxu2 %vm464_vm0, %v511_v3 }
  0x51   : > { %1368 = vmatpush.msk.msra.mxu3 %vm464_vm0, %v512_v4  ;;  %1367 = vmatmul.msk.f32.vlgmr.msra.gmra.mxu2 %vm460_vm1, %v446_v7 }
  0x52   : > { %1369 = vmatmul.msk.f32.vlgmr.msra.gmra.mxu3 %vm460_vm1, %v446_v7 }
  0x57   : > { %v563_v5 = vld.sshfl [vmem:[#allocation1] sm:$0xff pattern:$0x75316420]  ;;  %v564_v6 = vld.sshfl [vmem:[#allocation1 + $0x8] sm:$0xff pattern:$0x75316420] }
  0x58   : > { %565 = vrot.lane.b32.xlu1 %v563_v5, %s1750_s2  ;;  %1205 = vst [vmem:[#allocation1] ss:$2 sm:$0xff] %v417_v0 }
  0x60   : > { %567 = vrot.lane.b32.xlu1 %v564_v6, %s1750_s2 }
  0x9c   : > { %v627_v26 = vpop.permute.xlu2 %626 }
  0xba   : > { %v453_v10 = vpop.permute.xlu0 %452 }
  0xbb   : > { %v459_v12 = vsel %vm456_vm2, 0.0, %v453_v10 }
  0xbc   : > { %1362 = vmatpush.msk.msra.mxu0 %vm464_vm0, %v459_v12  ;;  %v833_v12 = vld [vmem:[#allocation8] sm:$0xf] }
  0xbd   : > { %1363 = vmatmul.msk.f32.vlgmr.msra.gmra.mxu0 %vm460_vm1, %v447_v11 }
  0xc2   : > { %v455_v13 = vpop.permute.xlu0 %454 }
  0xc3   : > { %v457_v14 = vsel %vm456_vm2, %v453_v10, %v455_v13  ;;  %vm1012_vm2 = vcmp.ge.s32.totalorder %v1975_v46, 2 }
  0xc4   : > { %1364 = vmatpush.msk.msra.mxu1 %vm464_vm0, %v457_v14 }
  0xc5   : > { %1365 = vmatmul.msk.f32.vlgmr.msra.gmra.mxu1 %vm460_vm1, %v447_v11 }
  0xca   : > { %v566_v15 = vpop.permute.xlu1 %565 }
  0xd2   : > { %v568_v16 = vpop.permute.xlu1 %567 }
  0xd3   : > { %v570_v18 = vsel %vm569_vm3, %v566_v15, %v568_v16  ;;  %v572_v19 = vsel %vm569_vm3, %v568_v16, 0.0  ;;  %vm1127_vm3 = vcmp.lt.s32.totalorder %v1961_v38, 14 }
  0xd4   : > { %1370 = vmatpush.msk.msrb.mxu0 %vm464_vm0, %v570_v18  ;;  %1372 = vmatpush.msk.msrb.mxu1 %vm464_vm0, %v572_v19  ;;  %v537_v23 = vpop.f32.mrf.mxu2 }
  0xd5   : > { %1371 = vmatmul.msk.f32.vlgmr.msrb.gmra.mxu0 %vm460_vm1, %v561_v17  ;;  %1373 = vmatmul.msk.f32.vlgmr.msrb.gmra.mxu1 %vm460_vm1, %v561_v17  ;;  %v557_v22 = vpop.f32.mrf.mxu3  ;;  %v940_v17 = vld [vmem:[#allocation8 + $0x8] sm:$0xf] }
 0x13a   : > { %v487_v20 = vpop.f32.mrf.mxu0 }
 0x13b   : > { %v538_v25 = vadd.f32 %v537_v23, %v487_v20 }
 0x142   : > { %v507_v21 = vpop.f32.mrf.mxu1 }
 0x143   : > { %v558_v24 = vadd.f32 %v557_v22, %v507_v21 }
 0x152   : > { %v598_v27 = vpop.f32.mrf.mxu0  ;;  %v618_v28 = vpop.f32.mrf.mxu1 }
 0x153   : > { %v621_v29 = vadd.f32 %v598_v27, %v538_v25  ;;  %v622_v30 = vadd.f32 %v618_v28, %v558_v24 }
 0x155   : > { %v629_v31 = vadd.f32 %v627_v26, %v621_v29  ;;  %v630_v32 = vadd.f32 %v627_v26, %v622_v30 }
 0x157   : > { %v631_v33 = vmax.f32 %v629_v31, 0.0  ;;  %v632_v34 = vmax.f32 %v630_v32, 0.0 }
 0x159   : > { %641 = vrot.lane.b32.xlu0 %v632_v34, %s1752_s23  ;;  %1380 = vmatpush.msk.msra.mxu1 %vm464_vm0, %v632_v34 }
 0x15a   : > { %753 = vrot.lane.b32.xlu1 %v631_v33, %s1753_s28  ;;  %639 = vrot.lane.b32.xlu2 %v631_v33, %s1752_s23 }
 0x15b   : > { %1378 = vmatpush.msk.msra.mxu0 %vm464_vm0, %v631_v33  ;;  %1381 = vmatmul.msk.f32.vlgmr.msra.gmra.mxu1 %vm460_vm1, %v634_v37 }
 0x15c   : > { %1379 = vmatmul.msk.f32.vlgmr.msra.gmra.mxu0 %vm460_vm1, %v634_v37 }
 0x161   : > { %824 = vperm.xlu0 %1516, %v821_v43   ;;  %v1030_v43 = vld [vmem:[#allocation10] sm:$0xf] }
 0x162   : > { %755 = vrot.lane.b32.xlu2 %v632_v34, %s1753_s28  ;;  %v1197_v34 = vld [vmem:[%s2064_s8] sm:$0xf]  ;;  %s1232_s28 = scalar_lea.hbm %s2065_s9, %s1416_s4 }
 0x163   : > { %s1236_s21 = sshll.u32 %s1232_s28, 4  ;;  %s1237_s21 = int_to_ptr.hbm [resolvable:$true] %s1236_s21 }
 0x164   : > { %s1681_s24 = sshra.s32 %s1237_s21, 4  ;;  %s1682_s24 = int_to_ptr.hbm [resolvable:$true] %s1681_s24 }
 0x165   : > { %p1688_p12 = scmp.lt.s32.totalorder %s1682_s24, %s2065_s9 }
 0x169   : > { %1002 = vperm.xlu0 %1516, %v999_v44  }
 0x1b4   : > { %v640_v39 = vpop.permute.xlu2 %639 }
 0x1b5   : > { %v647_v40 = vsel %vm643_vm4, 0.0, %v640_v39 }
 0x1b6   : > { %v652_v42 = vsel %vm635_vm5, %v647_v40, 0.0 }
 0x1b7   : > { %1374 = vmatpush.msk.msrb.mxu2 %vm464_vm0, %v652_v42 }
 0x1b8   : > { %1375 = vmatmul.msk.f32.vlgmr.msrb.gmra.mxu2 %vm460_vm1, %v654_v41 }
 0x1bc   : > { %v756_v47 = vpop.permute.xlu2 %755 }
 0x1bd   : > { %v761_v49 = vsel %vm757_vm6, %v756_v47, 0.0 }
 0x1be   : > { %v767_v56 = vsel %vm752_vm9, %v761_v49, 0.0  ;;  %v1145_v49 = vld [vmem:[#allocation10 + $0x8] sm:$0xf] }
 0x1cb   : > { %v642_v48 = vpop.permute.xlu0 %641 }
 0x1cc   : > { %v644_v50 = vsel %vm643_vm4, %v640_v39, %v642_v48  ;;  %v754_v51 = vpop.permute.xlu1 %753 }
 0x1cd   : > { %v758_v52 = vsel %vm757_vm6, %v754_v51, %v756_v47  ;;  %v653_v53 = vsel %vm636_vm7, %v644_v50, 0.0 }
 0x1ce   : > { %v766_v55 = vsel %vm751_vm8, %v758_v52, 0.0  ;;  %1376 = vmatpush.msk.msrb.mxu3 %vm464_vm0, %v653_v53 }
 0x1cf   : > { %1382 = vmatpush.msk.msra.mxu2 %vm464_vm0, %v766_v55  ;;  %1377 = vmatmul.msk.f32.vlgmr.msrb.gmra.mxu3 %vm460_vm1, %v654_v41 }
 0x1d0   : > { %1383 = vmatmul.msk.f32.vlgmr.msra.gmra.mxu2 %vm460_vm1, %v769_v54  ;;  %1384 = vmatpush.msk.msra.mxu3 %vm464_vm0, %v767_v56 }
 0x1d3   : > { %v825_v0 = vpop.permute.xlu0 %824 }
 0x1d7   : > { %1385 = vmatmul.msk.f32.vlgmr.msra.gmra.mxu3 %vm460_vm1, %v769_v54 }
 0x1d8   : > { %v748_v63 = vpop.f32.mrf.mxu1 }
 0x1d9   : > { %v728_v58 = vpop.f32.mrf.mxu0 }
 0x1db   : > { %v1003_v29 = vpop.permute.xlu0 %1002 }
 0x23b   : > { %v681_v57 = vpop.f32.mrf.mxu2 }
 0x23c   : > { %v729_v59 = vadd.f32 %v728_v58, %v681_v57 }
 0x252   : > { %v701_v60 = vpop.f32.mrf.mxu3 }
 0x253   : > { %v796_v61 = vpop.f32.mrf.mxu2  ;;  %v749_v2 = vadd.f32 %v748_v63, %v701_v60 }
 0x254   : > { %v819_v62 = vadd.f32 %v796_v61, %v729_v59  ;;  %v1206_v61 = vld.sshfl [vmem:[#allocation1] sm:$0xff pattern:$0x75316420] }
 0x256   : > { %v827_v1 = vadd.f32 %v825_v0, %v819_v62  ;;  %v1207_v62 = vld.sshfl [vmem:[#allocation1 + $0x8] sm:$0xff pattern:$0x75316420] }
 0x258   : > { %v829_v3 = vmax.f32 %v827_v1, 0.0 }
 0x25a   : > { %836 = vrot.lane.b32.xlu1 %v829_v3, %s1754_s15  ;;  %1390 = vmatpush.msk.msrb.mxu2 %vm464_vm0, %v829_v3  ;;  %v816_v4 = vpop.f32.mrf.mxu3 }
 0x25b   : > { %v820_v5 = vadd.f32 %v816_v4, %v749_v2  ;;  %1391 = vmatmul.msk.f32.vlgmr.msrb.gmra.mxu2 %vm460_vm1, %v832_v8 }
 0x25d   : > { %v828_v6 = vadd.f32 %v825_v0, %v820_v5 }
 0x25f   : > { %v830_v7 = vmax.f32 %v828_v6, 0.0 }
 0x261   : > { %838 = vrot.lane.b32.xlu2 %v830_v7, %s1754_s15  ;;  %1392 = vmatpush.msk.msrb.mxu3 %vm464_vm0, %v830_v7  ;;  %s1683_s15 = scalar_lea.hbm %s1682_s24, 8 }
 0x262   : > { %941 = vrot.lane.b32.xlu1 %v829_v3, %s1755_s14  ;;  %1393 = vmatmul.msk.f32.vlgmr.msrb.gmra.mxu3 %vm460_vm1, %v832_v8  ;;  %p1684_p1 = scmp.ne.s32.totalorder %s1682_s24, %s1683_s15  ;;  %p1689_p7 = scmp.lt.s32.totalorder %s1687_s19, %s1683_s15 }
 0x264   : > { %p1685_p3 = pnand %p1684_p1, %p1895_p4  ;;  %p1690_p8 = por %p1689_p7, %p1688_p12 }
 0x266   : > { %p1686_p5 = pneg %p1685_p3 }
 0x268   : > { %p1691_p9 = pnand %p1690_p8, %p1686_p5 }
 0x269   : > { %943 = vrot.lane.b32.xlu2 %v830_v7, %s1755_s14 }
 0x2bb   : > { %v839_v9 = vpop.permute.xlu2 %838 }
 0x2c3   : > { %v944_v10 = vpop.permute.xlu2 %943 }
 0x2c4   : > { %v948_v15 = vsel %vm945_vm11, %v944_v10, 0.0 }
 0x2cc   : > { %v837_v11 = vpop.permute.xlu1 %836 }
 0x2cd   : > { %v841_v13 = vsel %vm840_vm10, %v837_v11, %v839_v9  ;;  %v843_v14 = vsel %vm840_vm10, 0.0, %v837_v11 }
 0x2ce   : > { %1386 = vmatpush.msk.msrb.mxu0 %vm464_vm0, %v843_v14  ;;  %1388 = vmatpush.msk.msrb.mxu1 %vm464_vm0, %v841_v13 }
 0x2cf   : > { %1387 = vmatmul.msk.f32.vlgmr.msrb.gmra.mxu0 %vm460_vm1, %v833_v12  ;;  %1389 = vmatmul.msk.f32.vlgmr.msrb.gmra.mxu1 %vm460_vm1, %v833_v12 }
 0x2d0   : > { %1396 = vmatpush.msk.msra.mxu1 %vm464_vm0, %v948_v15 }
 0x2d4   : > { %v942_v16 = vpop.permute.xlu1 %941 }
 0x2d5   : > { %v946_v18 = vsel %vm945_vm11, %v942_v16, %v944_v10 }
 0x2d6   : > { %1394 = vmatpush.msk.msra.mxu0 %vm464_vm0, %v946_v18 }
 0x2d7   : > { %1395 = vmatmul.msk.f32.vlgmr.msra.gmra.mxu0 %vm460_vm1, %v940_v17  ;;  %1397 = vmatmul.msk.f32.vlgmr.msra.gmra.mxu1 %vm460_vm1, %v940_v17 }
 0x2de   : > { %v916_v22 = vpop.f32.mrf.mxu2 }
 0x2e5   : > { %v936_v21 = vpop.f32.mrf.mxu3 }
 0x34c   : > { %v869_v19 = vpop.f32.mrf.mxu0  ;;  %v889_v20 = vpop.f32.mrf.mxu1 }
 0x34d   : > { %v937_v23 = vadd.f32 %v936_v21, %v889_v20  ;;  %v917_v24 = vadd.f32 %v916_v22, %v869_v19 }
 0x354   : > { %v974_v25 = vpop.f32.mrf.mxu0  ;;  %v994_v26 = vpop.f32.mrf.mxu1 }
 0x355   : > { %v997_v27 = vadd.f32 %v974_v25, %v917_v24  ;;  %v998_v28 = vadd.f32 %v994_v26, %v937_v23 }
 0x357   : > { %v1005_v30 = vadd.f32 %v1003_v29, %v997_v27  ;;  %v1006_v31 = vadd.f32 %v1003_v29, %v998_v28 }
 0x359   : > { %v1007_v32 = vmax.f32 %v1005_v30, 0.0  ;;  %v1008_v33 = vmax.f32 %v1006_v31, 0.0 }
 0x35b   : > { %1131 = vrot.lane.b32.xlu0 %v1008_v33, %s1756_s27  ;;  %1017 = vrot.lane.b32.xlu2 %v1008_v33, %s1757_s3 }
 0x35c   : > { %1404 = vmatpush.msk.msrb.mxu1 %vm464_vm0, %v1008_v33  ;;  %1015 = vrot.lane.b32.xlu1 %v1007_v32, %s1757_s3 }
 0x35d   : > { %1402 = vmatpush.msk.msrb.mxu0 %vm464_vm0, %v1007_v32  ;;  %1405 = vmatmul.msk.f32.vlgmr.msrb.gmra.mxu1 %vm460_vm1, %v1010_v35 }
 0x35e   : > { %1403 = vmatmul.msk.f32.vlgmr.msrb.gmra.mxu0 %vm460_vm1, %v1010_v35 }
 0x363   : > { %1200 = vperm.xlu2 %1515, %v1197_v34  }
 0x364   : > { %1129 = vrot.lane.b32.xlu1 %v1007_v32, %s1756_s27 }
 0x3b5   : > { %v1018_v37 = vpop.permute.xlu2 %1017 }
 0x3bd   : > { %v1201_v60 = vpop.permute.xlu2 %1200 }
 0x3cd   : > { %v1132_v36 = vpop.permute.xlu0 %1131 }
 0x3ce   : > { %v1137_v39 = vsel %vm1133_vm12, %v1132_v36, 0.0  ;;  %v1016_v40 = vpop.permute.xlu1 %1015 }
 0x3cf   : > { %v1020_v41 = vsel %vm1019_vm13, %v1016_v40, %v1018_v37  ;;  %v1023_v42 = vsel %vm1019_vm13, 0.0, %v1016_v40  ;;  %v1143_v44 = vsel %vm1128_vm14, %v1137_v39, 0.0 }
 0x3d0   : > { %v1028_v45 = vsel %vm1011_vm15, %v1023_v42, 0.0  ;;  %v1029_v47 = vsel %vm1012_vm2, %v1020_v41, 0.0 }
 0x3d1   : > { %1398 = vmatpush.msk.msra.mxu2 %vm464_vm0, %v1028_v45  ;;  %1400 = vmatpush.msk.msra.mxu3 %vm464_vm0, %v1029_v47 }
 0x3d2   : > { %1399 = vmatmul.msk.f32.vlgmr.msra.gmra.mxu2 %vm460_vm1, %v1030_v43  ;;  %1401 = vmatmul.msk.f32.vlgmr.msra.gmra.mxu3 %vm460_vm1, %v1030_v43 }
 0x3d3   : > { %1408 = vmatpush.msk.msrb.mxu3 %vm464_vm0, %v1143_v44 }
 0x3d6   : > { %v1130_v46 = vpop.permute.xlu1 %1129 }
 0x3d7   : > { %v1134_v48 = vsel %vm1133_vm12, %v1130_v46, %v1132_v36 }
 0x3d8   : > { %v1142_v50 = vsel %vm1127_vm3, %v1134_v48, 0.0 }
 0x3d9   : > { %1406 = vmatpush.msk.msrb.mxu2 %vm464_vm0, %v1142_v50 }
 0x3da   : > { %1407 = vmatmul.msk.f32.vlgmr.msrb.gmra.mxu2 %vm460_vm1, %v1145_v49  ;;  %1409 = vmatmul.msk.f32.vlgmr.msrb.gmra.mxu3 %vm460_vm1, %v1145_v49  ;;  %v1124_v54 = vpop.f32.mrf.mxu1 }
 0x3db   : > { %v1104_v53 = vpop.f32.mrf.mxu0 }
 0x455   : > { %v1057_v51 = vpop.f32.mrf.mxu2  ;;  %v1077_v52 = vpop.f32.mrf.mxu3 }
 0x456   : > { %v1105_v55 = vadd.f32 %v1104_v53, %v1057_v51  ;;  %v1125_v56 = vadd.f32 %v1124_v54, %v1077_v52 }
 0x45d   : > { %v1172_v38 = vpop.f32.mrf.mxu2  ;;  %v1192_v57 = vpop.f32.mrf.mxu3 }
 0x45e   : > { %v1195_v58 = vadd.f32 %v1172_v38, %v1105_v55  ;;  %v1196_v59 = vadd.f32 %v1192_v57, %v1125_v56 }
 0x460   : > { %v1203_v63 = vadd.f32 %v1201_v60, %v1195_v58  ;;  %v1204_v0 = vadd.f32 %v1201_v60, %v1196_v59 }
 0x462   : > { %v1210_v1 = vadd.f32 %v1206_v61, %v1203_v63  ;;  %v1211_v2 = vadd.f32 %v1207_v62, %v1204_v0 }
 0x464   : > { %v1213_v3 = vmax.f32 %v1211_v2, 0.0  ;;  %v1212_v4 = vmax.f32 %v1210_v1, 0.0 }
 0x466   : > { %v1216_v5 = vrot.slane %v1213_v3, 4 }
 0x468   : > { %v1217_v6 = vsel %vm464_vm0, %v1212_v4, %v1216_v5 }
 0x469   : > { %1219 = vst [vmem:[%s416_s22] sm:$0xff] %v1217_v6 }
 0x46a   : > { %1694 = shalt.err (!%p1691_p9)
}
 0x46b   : > { %1435 = dma.vmem_to_hbm [thread:$0]  (%p1895_p4), %s1235_s20, 128, %s1237_s21, %s1221_s16  }
 0x46c PF: > { %s1248_s29 = sand.u32 1, %s1729_s30   ;;  %p2081_p10 = scmp.ge.s32.totalorder %s1741_s12, 2 }
 0x46d   : > { %s1249_s2 = scalar_lea.sflag [#allocation4], %s1248_s29 }
 0x46e   : > { %p1455_p13 = pnand %p2081_p10, %p1899_p6 }
 0x470   : > { %p1456_p11 = pneg %p1455_p13 }
 0x472   : > { %1724 = dma.done.wait (%p1456_p11), %s1249_s2, 128  }
 0x473   : > { %1726 = vsyncadd (%p1456_p11), %s1249_s2, 4294967168  ;;  %p24_p0 = scmp.ge.s32.totalorder %s1869_s25, 4   ;;  %s2082_s30 = smov %s1733_s10 }
 0x474   : > { %s2083_s10 = smov %s1737_s11  ;;  %s2084_s11 = smov %s1880_s26 }
 0x475   : > { %s2085_s12 = smov %s1869_s25  ;;  %26 = sbr.rel (!%p24_p0) target bundleno = 12 (0xc), region = 125 }
 0x47a   :  { %1255 = vsyncpa [#allocation3], 1 }
 0x47b   :  { %1257 = vsyncpa [#allocation3 + $0x1], 1 }
 0x47c   :  { %1258 = vsyncpa [#allocation6], 1 }
 0x47d   :  { %1259 = vsyncpa [#allocation9], 1 }
 0x47e   :  { %1260 = vsyncpa [#allocation4], 1 }
 0x47f   :  { %1262 = vsyncpa [#allocation4 + $0x1], 1 }

</bundles_post_ra>
